<compile_context>
chip_gen: v7x
topology: tpu7x:2x2x1
jax: 0.10.0
libtpu: 0.0.40
codegen_flags: <defaults>
</compile_context>

<pallas_src>
import math

import jax
import jax.numpy as jnp
from jax.experimental import pallas as pl
from jax.experimental.pallas import tpu as pltpu

BN_EPS = 1e-5


def _vmem_capacity_bytes():
    try:
        return int(pltpu.get_tpu_info().vmem_capacity_bytes)
    except Exception:
        return 64 * 1024 * 1024  # conservative fallback (v7x per-TC VMEM)


def mhablock_pallas(x, gamma, beta, in_proj_weight, out_proj_weight, num_heads,
                    *, matmul_dtype=jnp.float32, force_two_pass=False):
    """x: (B, S, H). in_proj_weight: (3H, H) PyTorch layout. out_proj_weight: (H, H).

    Returns (B, S, H)."""
    B, S, H = x.shape
    assert H % num_heads == 0, "hidden_size must be divisible by num_heads"
    NH = num_heads
    HD = H // NH
    M = B * S
    sm_scale = 1.0 / math.sqrt(HD)

    itemsize = jnp.dtype(x.dtype).itemsize
    wbytes = jnp.dtype(matmul_dtype).itemsize
    use_approx_recip = jnp.dtype(matmul_dtype) != jnp.dtype(jnp.float32)
    vmem_cap = _vmem_capacity_bytes()

    # Fused QKV weight (H, 3H) with sm_scale folded into the Q columns; out-proj
    # transposed to (in, out).  Cast to the matmul operand dtype once here so the
    # resident weight buffers are halved in the bf16 case.
    wq_t = in_proj_weight[:H].T * sm_scale
    wk_t = in_proj_weight[H:2 * H].T
    wv_t = in_proj_weight[2 * H:].T
    wqkv_t = jnp.concatenate([wq_t, wk_t, wv_t], axis=1).astype(matmul_dtype)  # (H, 3H)
    wo_t = out_proj_weight.T.astype(matmul_dtype)                              # (H, H)

    gamma2 = gamma.reshape(1, H).astype(jnp.float32)
    beta2 = beta.reshape(1, H).astype(jnp.float32)

    # ------------------------------------------------------------------
    # Shared attention body: per-head scores/softmax/PV for one batch element.
    # Per-head contexts land in a VMEM scratch (columns lo:hi) so that the
    # out-projection is a single K=H matmul afterwards.
    # NOTE: the head loop stays a static Python `for` (NH is small and the
    # slices are static); a fori_loop would force dynamic lane slices.
    # ------------------------------------------------------------------
    def _attend(qkv_b, ctx_ref, r0):
        q = qkv_b[:, 0:H]
        k = qkv_b[:, H:2 * H]
        v = qkv_b[:, 2 * H:3 * H]
        for h in range(NH):
            lo, hi = h * HD, (h + 1) * HD
            qh = q[:, lo:hi].astype(matmul_dtype)
            kh = k[:, lo:hi].astype(matmul_dtype)
            s = jax.lax.dot_general(qh, kh, (((1,), (1,)), ((), ())),
                                    preferred_element_type=jnp.float32)   # (S, S)
            s = s - jnp.max(s, axis=-1, keepdims=True)                     # stable softmax
            p = jnp.exp(s)
            l = jnp.sum(p, axis=-1, keepdims=True)
            ctx = jnp.dot(p.astype(matmul_dtype), v[:, lo:hi].astype(matmul_dtype),
                          preferred_element_type=jnp.float32)              # (S, HD)
            # Deferred normalization: scale the (S, HD) context, not the (S, S) probs.
            ctx_ref[r0:r0 + S, lo:hi] = ctx * pl.reciprocal(l, approx=use_approx_recip)

    # ------------------------------------------------------------------
    # Fully fused single-call path for small problems (launch-overhead bound).
    # ------------------------------------------------------------------
    fused_bytes = (2 * M * H * itemsize                 # x block + out block
                   + 4 * (5 * M * H)                    # xn + qkv(3H) + ctx, f32
                   + 4 * B * NH * S * S                 # score tiles (upper bound)
                   + 4 * H * H * wbytes)                # resident fused weights
    use_fused = (not force_two_pass) and (2 * fused_bytes <= max(vmem_cap // 2, 16 << 20))

    if use_fused:
        def fused_kernel(x_ref, g_ref, b_ref, wqkv_ref, wo_ref, o_ref, ctx_ref):
            xf = x_ref[...].astype(jnp.float32)                            # (M, H)
            mean = jnp.mean(xf, axis=0, keepdims=True)
            xc = xf - mean
            var = jnp.mean(xc * xc, axis=0, keepdims=True)                 # biased, mean-centered
            xn = xc * (g_ref[...] * jax.lax.rsqrt(var + BN_EPS)) + b_ref[...]
            qkv = jnp.dot(xn.astype(matmul_dtype), wqkv_ref[...],
                          preferred_element_type=jnp.float32)              # (M, 3H), one MXU push
            for b in range(B):
                r0 = b * S
                _attend(qkv[r0:r0 + S, :], ctx_ref, r0)
            # Single K=H out-projection over all B*S rows.
            o_ref[...] = jnp.dot(ctx_ref[...].astype(matmul_dtype), wo_ref[...],
                                 preferred_element_type=jnp.float32).astype(o_ref.dtype)

        vmem_limit = int(min(max(4 * fused_bytes, 16 << 20), int(0.9 * vmem_cap)))
        flops = 8 * M * H * H + 4 * B * S * S * H + 8 * M * H
        out2 = pl.pallas_call(
            fused_kernel,
            out_shape=jax.ShapeDtypeStruct((M, H), x.dtype),
            grid=(1,),
            in_specs=[
                pl.BlockSpec((M, H), lambda i: (0, 0)),        # x rows (all of them)
                pl.BlockSpec((1, H), lambda i: (0, 0)),        # gamma
                pl.BlockSpec((1, H), lambda i: (0, 0)),        # beta
                pl.BlockSpec((H, 3 * H), lambda i: (0, 0)),    # fused Wqkv
                pl.BlockSpec((H, H), lambda i: (0, 0)),        # Wo
            ],
            out_specs=pl.BlockSpec((M, H), lambda i: (0, 0)),
            scratch_shapes=[pltpu.VMEM((M, H), jnp.float32)],  # per-head ctx slab
            compiler_params=pltpu.CompilerParams(
                dimension_semantics=("arbitrary",),
                vmem_limit_bytes=vmem_limit),
            cost_estimate=pl.CostEstimate(
                flops=int(flops),
                transcendentals=int(B * NH * S * S),
                bytes_accessed=int(2 * M * H * itemsize + 4 * H * H * wbytes + 4 * H * 4)),
        )(x.reshape(M, H), gamma2, beta2, wqkv_t, wo_t)
        return out2.reshape(B, S, H)

    # ------------------------------------------------------------------
    # Two-pass path for large M.
    # Pass 1: tiled BatchNorm statistics -> fused (scale, shift) of shape (2, H).
    # ------------------------------------------------------------------
    x2 = x.reshape(M, H)

    TM = 512                                   # big tiles -> HBM roofline on this mem-bound pass
    while TM > 8 and 2 * TM * H * itemsize > max(vmem_cap // 8, 4 << 20):
        TM //= 2
    TM = max(8, min(TM, ((M + 7) // 8) * 8))   # never a block bigger than the (padded) array
    n_tiles = pl.cdiv(M, TM)

    def bn_stats_kernel(x_ref, g_ref, b_ref, ss_ref, sum_ref, sq_ref):
        i = pl.program_id(0)

        @pl.when(i == 0)
        def _():
            sum_ref[...] = jnp.zeros_like(sum_ref)
            sq_ref[...] = jnp.zeros_like(sq_ref)

        xt = x_ref[...].astype(jnp.float32)                        # (TM, H)
        if M % TM != 0:                                            # mask the ragged tail tile
            row = i * TM + jax.lax.broadcasted_iota(jnp.int32, (TM, 1), 0)
            xt = jnp.where(row < M, xt, 0.0)
        sum_ref[...] += jnp.sum(xt, axis=0, keepdims=True)
        sq_ref[...] += jnp.sum(xt * xt, axis=0, keepdims=True)

        @pl.when(i == pl.num_programs(0) - 1)
        def _():
            inv_m = 1.0 / float(M)
            mean = sum_ref[...] * inv_m
            # TODO(synk): E[x^2]-E[x]^2 can lose precision for data with a large
            # mean at very large M; use a Welford/two-pass accumulation if needed.
            var = jnp.maximum(sq_ref[...] * inv_m - mean * mean, 0.0)
            scl = g_ref[...].astype(jnp.float32) * jax.lax.rsqrt(var + BN_EPS)
            ss_ref[0:1, :] = scl
            ss_ref[1:2, :] = b_ref[...].astype(jnp.float32) - mean * scl

    vmem_limit_p1 = int(min(max(4 * TM * H * itemsize + (1 << 20), 8 << 20),
                            int(0.9 * vmem_cap)))
    ss = pl.pallas_call(
        bn_stats_kernel,
        out_shape=jax.ShapeDtypeStruct((2, H), jnp.float32),
        grid=(n_tiles,),
        in_specs=[
            pl.BlockSpec((TM, H), lambda i: (i, 0)),      # x rows, pipelined
            pl.BlockSpec((1, H), lambda i: (0, 0)),       # gamma (resident)
            pl.BlockSpec((1, H), lambda i: (0, 0)),       # beta  (resident)
        ],
        out_specs=pl.BlockSpec((2, H), lambda i: (0, 0)),  # accumulator output
        scratch_shapes=[pltpu.VMEM((1, H), jnp.float32),
                        pltpu.VMEM((1, H), jnp.float32)],
        compiler_params=pltpu.CompilerParams(
            dimension_semantics=("arbitrary",),            # global reduction axis
            vmem_limit_bytes=vmem_limit_p1),
        cost_estimate=pl.CostEstimate(
            flops=int(3 * M * H), transcendentals=0,
            bytes_accessed=int(M * H * itemsize + 6 * H * 4)),
    )(x2, gamma2, beta2)

    # ------------------------------------------------------------------
    # Pass 2: fused BN-apply + multi-head self-attention, grid over batch.
    # ------------------------------------------------------------------
    def mha_kernel(x_ref, ss_ref, wqkv_ref, wo_ref, o_ref, ctx_ref):
        xb = x_ref[0].astype(jnp.float32)                          # (S, H)
        xn = xb * ss_ref[0:1, :] + ss_ref[1:2, :]                  # BN as a single FMA
        qkv = jnp.dot(xn.astype(matmul_dtype), wqkv_ref[...],
                      preferred_element_type=jnp.float32)          # (S, 3H), fused QKV
        _attend(qkv, ctx_ref, 0)
        o_ref[0] = jnp.dot(ctx_ref[...].astype(matmul_dtype), wo_ref[...],
                           preferred_element_type=jnp.float32).astype(o_ref.dtype)

    blk_bytes = (2 * 2 * S * H * itemsize                  # x + out blocks, double-buffered
                 + 2 * 2 * H * 4                           # ss
                 + 2 * 4 * H * H * wbytes                  # resident Wqkv + Wo
                 + 4 * (5 * S * H + NH * S * S))           # xn/qkv/ctx/scores intermediates
    vmem_limit_p2 = int(min(max(2 * blk_bytes, 16 << 20), int(0.9 * vmem_cap)))
    # TODO(synk): when blk_bytes approaches the VMEM budget (long S), switch to a
    # flash-style (query-tile, kv-tile) decomposition instead of the full-S block.
    # TODO(synk): for B == 1 (or odd B) on v7x, add a second "parallel" grid axis
    # (query tiles / head groups) so both TensorCores get work.

    flops = B * (8 * S * H * H + 4 * S * S * H)
    bytes_accessed = 2 * B * S * H * itemsize + 4 * H * H * wbytes + 2 * H * 4

    out = pl.pallas_call(
        mha_kernel,
        out_shape=jax.ShapeDtypeStruct((B, S, H), x.dtype),
        grid=(B,),
        in_specs=[
            pl.BlockSpec((1, S, H), lambda b: (b, 0, 0)),  # one batch element
            pl.BlockSpec((2, H), lambda b: (0, 0)),        # BN scale/shift (resident)
            pl.BlockSpec((H, 3 * H), lambda b: (0, 0)),    # fused Wqkv (resident)
            pl.BlockSpec((H, H), lambda b: (0, 0)),        # Wo (resident)
        ],
        out_specs=pl.BlockSpec((1, S, H), lambda b: (b, 0, 0)),
        scratch_shapes=[pltpu.VMEM((S, H), jnp.float32)],  # per-head ctx slab
        compiler_params=pltpu.CompilerParams(
            dimension_semantics=("parallel",),             # megacore on v7x
            vmem_limit_bytes=vmem_limit_p2),
        cost_estimate=pl.CostEstimate(
            flops=int(flops),
            transcendentals=int(B * NH * S * S),
            bytes_accessed=int(bytes_accessed)),
    )(x, ss, wqkv_t, wo_t)
    return out


def mhablock_ref(x, gamma, beta, in_proj_weight, out_proj_weight, num_heads):
    """Pure-JAX reference with identical semantics."""
    B, S, H = x.shape
    hd = H // num_heads
    xf = x.astype(jnp.float32)
    xr = xf.reshape(B * S, H)
    mean = jnp.mean(xr, axis=0)
    var = jnp.mean((xr - mean) ** 2, axis=0)
    xn = (xf - mean) * jax.lax.rsqrt(var + BN_EPS) * gamma + beta

    wq = in_proj_weight[:H]
    wk = in_proj_weight[H:2 * H]
    wv = in_proj_weight[2 * H:]
    q = xn @ wq.T
    k = xn @ wk.T
    v = xn @ wv.T

    def split(t):  # (B,S,H) -> (B, nh, S, hd)
        return t.reshape(B, S, num_heads, hd).transpose(0, 2, 1, 3)

    qh, kh, vh = split(q), split(k), split(v)
    scores = jnp.einsum('bhqd,bhkd->bhqk', qh, kh) / math.sqrt(hd)
    p = jax.nn.softmax(scores, axis=-1)
    ctx = jnp.einsum('bhqk,bhkd->bhqd', p, vh)
    ctx = ctx.transpose(0, 2, 1, 3).reshape(B, S, H)
    out = ctx @ out_proj_weight.T
    return out.astype(x.dtype)


if __name__ == "__main__":
    # Small shapes implied by the forward: (batch, seq, hidden), num_heads.
    B, S, H, NH = 2, 8, 32, 4

    key = jax.random.PRNGKey(0)
    kx, kin, kout, kg, kb = jax.random.split(key, 5)

    x = jax.random.normal(kx, (B, S, H), dtype=jnp.float32)

    # PyTorch-layout MHA weights (bias=False): in_proj (3H, H), out_proj (H, H).
    bound = 1.0 / math.sqrt(H)
    in_proj_weight = jax.random.uniform(kin, (3 * H, H), jnp.float32, -bound, bound)
    out_proj_weight = jax.random.uniform(kout, (H, H), jnp.float32, -bound, bound)

    # BatchNorm1d affine params (perturbed from the default gamma=1, beta=0).
    gamma = 1.0 + 0.1 * jax.random.normal(kg, (H,), dtype=jnp.float32)
    beta = 0.1 * jax.random.normal(kb, (H,), dtype=jnp.float32)

    ref = mhablock_ref(x, gamma, beta, in_proj_weight, out_proj_weight, NH)

    # 1) Fused single-call path (auto-selected at these tiny shapes), f32 matmuls.
    out = jax.block_until_ready(
        mhablock_pallas(x, gamma, beta, in_proj_weight, out_proj_weight, NH))
    assert out.shape == (B, S, H)
    err = jnp.max(jnp.abs(out - ref))
    assert jnp.allclose(out, ref, atol=2e-4, rtol=2e-4), \
        f"fused f32 mismatch vs reference (max abs err {err})"

    # 2) Two-pass (BN-stats + per-batch MHA) path, exercised explicitly.
    out2 = jax.block_until_ready(
        mhablock_pallas(x, gamma, beta, in_proj_weight, out_proj_weight, NH,
                        force_two_pass=True))
    err2 = jnp.max(jnp.abs(out2 - ref))
    assert jnp.allclose(out2, ref, atol=2e-4, rtol=2e-4), \
        f"two-pass f32 mismatch vs reference (max abs err {err2})"

    # 3) bf16 matmul operands with f32 accumulation (looser tolerance).
    out3 = jax.block_until_ready(
        mhablock_pallas(x, gamma, beta, in_proj_weight, out_proj_weight, NH,
                        matmul_dtype=jnp.bfloat16))
    err3 = jnp.max(jnp.abs(out3 - ref))
    assert jnp.allclose(out3, ref, atol=5e-2, rtol=5e-2), \
        f"fused bf16 mismatch vs reference (max abs err {err3})"

    print("KERNEL_OK")
</pallas_src>

<mosaic_0001>
module attributes {stable_mosaic.version = 11 : i64} {
  func.func @fused_kernel(%arg0: i32, %arg1: memref<16x32xf32, #tpu.memory_space<vmem>>, %arg2: memref<1x32xf32, #tpu.memory_space<vmem>>, %arg3: memref<1x32xf32, #tpu.memory_space<vmem>>, %arg4: memref<32x96xf32, #tpu.memory_space<vmem>>, %arg5: memref<32x32xf32, #tpu.memory_space<vmem>>, %arg6: memref<16x32xf32, #tpu.memory_space<vmem>>, %arg7: memref<16x32xf32, #tpu.memory_space<vmem>>) attributes {dimension_semantics = [#tpu.dimension_semantics<arbitrary>], iteration_bounds = array<i64: 1>, scalar_prefetch = 0 : i64, scratch_operands = 1 : i64, tpu.core_type = #tpu.core_type<tc>, window_params = [{pipeline_mode = #tpu.pipeline_mode<synchronous>, transform_indices = @transform_0, window_bounds = array<i64: 16, 32>}, {pipeline_mode = #tpu.pipeline_mode<synchronous>, transform_indices = @transform_1, window_bounds = array<i64: 1, 32>}, {pipeline_mode = #tpu.pipeline_mode<synchronous>, transform_indices = @transform_2, window_bounds = array<i64: 1, 32>}, {pipeline_mode = #tpu.pipeline_mode<synchronous>, transform_indices = @transform_3, window_bounds = array<i64: 32, 96>}, {pipeline_mode = #tpu.pipeline_mode<synchronous>, transform_indices = @transform_4, window_bounds = array<i64: 32, 32>}, {pipeline_mode = #tpu.pipeline_mode<synchronous>, transform_indices = @transform_5, window_bounds = array<i64: 16, 32>}]} {
    %c0 = arith.constant 0 : index
    %c0_0 = arith.constant 0 : index
    %0 = vector.load %arg1[%c0, %c0_0] : memref<16x32xf32, #tpu.memory_space<vmem>>, vector<16x32xf32>
    %cst = arith.constant dense<0.000000e+00> : vector<32xf32>
    %1 = vector.multi_reduction <add>, %0, %cst [0] : vector<16x32xf32> to vector<32xf32>
    %2 = vector.shape_cast %1 : vector<32xf32> to vector<1x32xf32>
    %cst_1 = arith.constant 1.600000e+01 : f32
    %3 = vector.broadcast %cst_1 : f32 to vector<1x32xf32>
    %4 = arith.divf %2, %3 : vector<1x32xf32>
    %5 = vector.broadcast %4 : vector<1x32xf32> to vector<16x32xf32>
    %6 = arith.subf %0, %5 : vector<16x32xf32>
    %7 = arith.mulf %6, %6 : vector<16x32xf32>
    %cst_2 = arith.constant dense<0.000000e+00> : vector<32xf32>
    %8 = vector.multi_reduction <add>, %7, %cst_2 [0] : vector<16x32xf32> to vector<32xf32>
    %9 = vector.shape_cast %8 : vector<32xf32> to vector<1x32xf32>
    %cst_3 = arith.constant 1.600000e+01 : f32
    %10 = vector.broadcast %cst_3 : f32 to vector<1x32xf32>
    %11 = arith.divf %9, %10 : vector<1x32xf32>
    %c0_4 = arith.constant 0 : index
    %c0_5 = arith.constant 0 : index
    %12 = vector.load %arg2[%c0_4, %c0_5] : memref<1x32xf32, #tpu.memory_space<vmem>>, vector<1x32xf32>
    %cst_6 = arith.constant 9.99999974E-6 : f32
    %13 = vector.broadcast %cst_6 : f32 to vector<1x32xf32>
    %14 = arith.addf %11, %13 : vector<1x32xf32>
    %15 = math.rsqrt %14 : vector<1x32xf32>
    %16 = arith.mulf %12, %15 : vector<1x32xf32>
    %17 = vector.broadcast %16 : vector<1x32xf32> to vector<16x32xf32>
    %18 = arith.mulf %6, %17 : vector<16x32xf32>
    %c0_7 = arith.constant 0 : index
    %c0_8 = arith.constant 0 : index
    %19 = vector.load %arg3[%c0_7, %c0_8] : memref<1x32xf32, #tpu.memory_space<vmem>>, vector<1x32xf32>
    %20 = vector.broadcast %19 : vector<1x32xf32> to vector<16x32xf32>
    %21 = arith.addf %18, %20 : vector<16x32xf32>
    %c0_9 = arith.constant 0 : index
    %c0_10 = arith.constant 0 : index
    %22 = vector.load %arg4[%c0_9, %c0_10] : memref<32x96xf32, #tpu.memory_space<vmem>>, vector<32x96xf32>
    %cst_11 = arith.constant dense<0.000000e+00> : vector<16x96xf32>
    %23 = tpu.matmul %21, %22, %cst_11 {dimension_numbers = #tpu.dot_dimension_numbers<[1], [0], [0], [1], [0, 0, 1, 1], [], []>} : vector<16x32xf32>, vector<32x96xf32>, vector<16x96xf32> -> vector<16x96xf32>
    %24 = vector.extract_strided_slice %23 {offsets = [0, 0], sizes = [8, 96], strides = [1, 1]} : vector<16x96xf32> to vector<8x96xf32>
    %25 = vector.extract_strided_slice %24 {offsets = [0, 0], sizes = [8, 32], strides = [1, 1]} : vector<8x96xf32> to vector<8x32xf32>
    %26 = vector.extract_strided_slice %24 {offsets = [0, 32], sizes = [8, 32], strides = [1, 1]} : vector<8x96xf32> to vector<8x32xf32>
    %27 = vector.extract_strided_slice %24 {offsets = [0, 64], sizes = [8, 32], strides = [1, 1]} : vector<8x96xf32> to vector<8x32xf32>
    %28 = vector.extract_strided_slice %25 {offsets = [0, 0], sizes = [8, 8], strides = [1, 1]} : vector<8x32xf32> to vector<8x8xf32>
    %29 = vector.extract_strided_slice %26 {offsets = [0, 0], sizes = [8, 8], strides = [1, 1]} : vector<8x32xf32> to vector<8x8xf32>
    %cst_12 = arith.constant dense<0.000000e+00> : vector<8x8xf32>
    %30 = tpu.matmul %28, %29, %cst_12 {dimension_numbers = #tpu.dot_dimension_numbers<[1], [1], [0], [0], [0, 0, 1, 0], [], []>} : vector<8x8xf32>, vector<8x8xf32>, vector<8x8xf32> -> vector<8x8xf32>
    %cst_13 = arith.constant dense<0xFF800000> : vector<8xf32>
    %31 = vector.multi_reduction <maximumf>, %30, %cst_13 [1] : vector<8x8xf32> to vector<8xf32>
    %32 = vector.shape_cast %31 : vector<8xf32> to vector<8x1xf32>
    %33 = vector.broadcast %32 : vector<8x1xf32> to vector<8x8xf32>
    %34 = arith.subf %30, %33 : vector<8x8xf32>
    %35 = math.exp %34 : vector<8x8xf32>
    %cst_14 = arith.constant dense<0.000000e+00> : vector<8xf32>
    %36 = vector.multi_reduction <add>, %35, %cst_14 [1] : vector<8x8xf32> to vector<8xf32>
    %37 = vector.shape_cast %36 : vector<8xf32> to vector<8x1xf32>
    %38 = vector.extract_strided_slice %27 {offsets = [0, 0], sizes = [8, 8], strides = [1, 1]} : vector<8x32xf32> to vector<8x8xf32>
    %cst_15 = arith.constant dense<0.000000e+00> : vector<8x8xf32>
    %39 = tpu.matmul %35, %38, %cst_15 {dimension_numbers = #tpu.dot_dimension_numbers<[1], [0], [0], [1], [0, 0, 1, 1], [], []>} : vector<8x8xf32>, vector<8x8xf32>, vector<8x8xf32> -> vector<8x8xf32>
    %40 = tpu.reciprocal %37 : vector<8x1xf32> -> vector<8x1xf32>
    %41 = vector.broadcast %40 : vector<8x1xf32> to vector<8x8xf32>
    %42 = arith.mulf %39, %41 : vector<8x8xf32>
    %c0_16 = arith.constant 0 : index
    %c0_17 = arith.constant 0 : index
    %43 = vector.load %arg7[%c0_16, %c0_17] : memref<16x32xf32, #tpu.memory_space<vmem>>, vector<8x8xf32>
    tpu.vector_store %arg7[%c0_16, %c0_17], %42 {strides = array<i32>} : memref<16x32xf32, #tpu.memory_space<vmem>>, vector<8x8xf32>,
    %44 = vector.extract_strided_slice %25 {offsets = [0, 8], sizes = [8, 8], strides = [1, 1]} : vector<8x32xf32> to vector<8x8xf32>
    %45 = vector.extract_strided_slice %26 {offsets = [0, 8], sizes = [8, 8], strides = [1, 1]} : vector<8x32xf32> to vector<8x8xf32>
    %cst_18 = arith.constant dense<0.000000e+00> : vector<8x8xf32>
    %46 = tpu.matmul %44, %45, %cst_18 {dimension_numbers = #tpu.dot_dimension_numbers<[1], [1], [0], [0], [0, 0, 1, 0], [], []>} : vector<8x8xf32>, vector<8x8xf32>, vector<8x8xf32> -> vector<8x8xf32>
    %cst_19 = arith.constant dense<0xFF800000> : vector<8xf32>
    %47 = vector.multi_reduction <maximumf>, %46, %cst_19 [1] : vector<8x8xf32> to vector<8xf32>
    %48 = vector.shape_cast %47 : vector<8xf32> to vector<8x1xf32>
    %49 = vector.broadcast %48 : vector<8x1xf32> to vector<8x8xf32>
    %50 = arith.subf %46, %49 : vector<8x8xf32>
    %51 = math.exp %50 : vector<8x8xf32>
    %cst_20 = arith.constant dense<0.000000e+00> : vector<8xf32>
    %52 = vector.multi_reduction <add>, %51, %cst_20 [1] : vector<8x8xf32> to vector<8xf32>
    %53 = vector.shape_cast %52 : vector<8xf32> to vector<8x1xf32>
    %54 = vector.extract_strided_slice %27 {offsets = [0, 8], sizes = [8, 8], strides = [1, 1]} : vector<8x32xf32> to vector<8x8xf32>
    %cst_21 = arith.constant dense<0.000000e+00> : vector<8x8xf32>
    %55 = tpu.matmul %51, %54, %cst_21 {dimension_numbers = #tpu.dot_dimension_numbers<[1], [0], [0], [1], [0, 0, 1, 1], [], []>} : vector<8x8xf32>, vector<8x8xf32>, vector<8x8xf32> -> vector<8x8xf32>
    %56 = tpu.reciprocal %53 : vector<8x1xf32> -> vector<8x1xf32>
    %57 = vector.broadcast %56 : vector<8x1xf32> to vector<8x8xf32>
    %58 = arith.mulf %55, %57 : vector<8x8xf32>
    %c0_22 = arith.constant 0 : index
    %c8 = arith.constant 8 : index
    %59 = vector.load %arg7[%c0_22, %c8] : memref<16x32xf32, #tpu.memory_space<vmem>>, vector<8x8xf32>
    tpu.vector_store %arg7[%c0_22, %c8], %58 {strides = array<i32>} : memref<16x32xf32, #tpu.memory_space<vmem>>, vector<8x8xf32>,
    %60 = vector.extract_strided_slice %25 {offsets = [0, 16], sizes = [8, 8], strides = [1, 1]} : vector<8x32xf32> to vector<8x8xf32>
    %61 = vector.extract_strided_slice %26 {offsets = [0, 16], sizes = [8, 8], strides = [1, 1]} : vector<8x32xf32> to vector<8x8xf32>
    %cst_23 = arith.constant dense<0.000000e+00> : vector<8x8xf32>
    %62 = tpu.matmul %60, %61, %cst_23 {dimension_numbers = #tpu.dot_dimension_numbers<[1], [1], [0], [0], [0, 0, 1, 0], [], []>} : vector<8x8xf32>, vector<8x8xf32>, vector<8x8xf32> -> vector<8x8xf32>
    %cst_24 = arith.constant dense<0xFF800000> : vector<8xf32>
    %63 = vector.multi_reduction <maximumf>, %62, %cst_24 [1] : vector<8x8xf32> to vector<8xf32>
    %64 = vector.shape_cast %63 : vector<8xf32> to vector<8x1xf32>
    %65 = vector.broadcast %64 : vector<8x1xf32> to vector<8x8xf32>
    %66 = arith.subf %62, %65 : vector<8x8xf32>
    %67 = math.exp %66 : vector<8x8xf32>
    %cst_25 = arith.constant dense<0.000000e+00> : vector<8xf32>
    %68 = vector.multi_reduction <add>, %67, %cst_25 [1] : vector<8x8xf32> to vector<8xf32>
    %69 = vector.shape_cast %68 : vector<8xf32> to vector<8x1xf32>
    %70 = vector.extract_strided_slice %27 {offsets = [0, 16], sizes = [8, 8], strides = [1, 1]} : vector<8x32xf32> to vector<8x8xf32>
    %cst_26 = arith.constant dense<0.000000e+00> : vector<8x8xf32>
    %71 = tpu.matmul %67, %70, %cst_26 {dimension_numbers = #tpu.dot_dimension_numbers<[1], [0], [0], [1], [0, 0, 1, 1], [], []>} : vector<8x8xf32>, vector<8x8xf32>, vector<8x8xf32> -> vector<8x8xf32>
    %72 = tpu.reciprocal %69 : vector<8x1xf32> -> vector<8x1xf32>
    %73 = vector.broadcast %72 : vector<8x1xf32> to vector<8x8xf32>
    %74 = arith.mulf %71, %73 : vector<8x8xf32>
    %c0_27 = arith.constant 0 : index
    %c16 = arith.constant 16 : index
    %75 = vector.load %arg7[%c0_27, %c16] : memref<16x32xf32, #tpu.memory_space<vmem>>, vector<8x8xf32>
    tpu.vector_store %arg7[%c0_27, %c16], %74 {strides = array<i32>} : memref<16x32xf32, #tpu.memory_space<vmem>>, vector<8x8xf32>,
    %76 = vector.extract_strided_slice %25 {offsets = [0, 24], sizes = [8, 8], strides = [1, 1]} : vector<8x32xf32> to vector<8x8xf32>
    %77 = vector.extract_strided_slice %26 {offsets = [0, 24], sizes = [8, 8], strides = [1, 1]} : vector<8x32xf32> to vector<8x8xf32>
    %cst_28 = arith.constant dense<0.000000e+00> : vector<8x8xf32>
    %78 = tpu.matmul %76, %77, %cst_28 {dimension_numbers = #tpu.dot_dimension_numbers<[1], [1], [0], [0], [0, 0, 1, 0], [], []>} : vector<8x8xf32>, vector<8x8xf32>, vector<8x8xf32> -> vector<8x8xf32>
    %cst_29 = arith.constant dense<0xFF800000> : vector<8xf32>
    %79 = vector.multi_reduction <maximumf>, %78, %cst_29 [1] : vector<8x8xf32> to vector<8xf32>
    %80 = vector.shape_cast %79 : vector<8xf32> to vector<8x1xf32>
    %81 = vector.broadcast %80 : vector<8x1xf32> to vector<8x8xf32>
    %82 = arith.subf %78, %81 : vector<8x8xf32>
    %83 = math.exp %82 : vector<8x8xf32>
    %cst_30 = arith.constant dense<0.000000e+00> : vector<8xf32>
    %84 = vector.multi_reduction <add>, %83, %cst_30 [1] : vector<8x8xf32> to vector<8xf32>
    %85 = vector.shape_cast %84 : vector<8xf32> to vector<8x1xf32>
    %86 = vector.extract_strided_slice %27 {offsets = [0, 24], sizes = [8, 8], strides = [1, 1]} : vector<8x32xf32> to vector<8x8xf32>
    %cst_31 = arith.constant dense<0.000000e+00> : vector<8x8xf32>
    %87 = tpu.matmul %83, %86, %cst_31 {dimension_numbers = #tpu.dot_dimension_numbers<[1], [0], [0], [1], [0, 0, 1, 1], [], []>} : vector<8x8xf32>, vector<8x8xf32>, vector<8x8xf32> -> vector<8x8xf32>
    %88 = tpu.reciprocal %85 : vector<8x1xf32> -> vector<8x1xf32>
    %89 = vector.broadcast %88 : vector<8x1xf32> to vector<8x8xf32>
    %90 = arith.mulf %87, %89 : vector<8x8xf32>
    %c0_32 = arith.constant 0 : index
    %c24 = arith.constant 24 : index
    %91 = vector.load %arg7[%c0_32, %c24] : memref<16x32xf32, #tpu.memory_space<vmem>>, vector<8x8xf32>
    tpu.vector_store %arg7[%c0_32, %c24], %90 {strides = array<i32>} : memref<16x32xf32, #tpu.memory_space<vmem>>, vector<8x8xf32>,
    %92 = vector.extract_strided_slice %23 {offsets = [8, 0], sizes = [8, 96], strides = [1, 1]} : vector<16x96xf32> to vector<8x96xf32>
    %93 = vector.extract_strided_slice %92 {offsets = [0, 0], sizes = [8, 32], strides = [1, 1]} : vector<8x96xf32> to vector<8x32xf32>
    %94 = vector.extract_strided_slice %92 {offsets = [0, 32], sizes = [8, 32], strides = [1, 1]} : vector<8x96xf32> to vector<8x32xf32>
    %95 = vector.extract_strided_slice %92 {offsets = [0, 64], sizes = [8, 32], strides = [1, 1]} : vector<8x96xf32> to vector<8x32xf32>
    %96 = vector.extract_strided_slice %93 {offsets = [0, 0], sizes = [8, 8], strides = [1, 1]} : vector<8x32xf32> to vector<8x8xf32>
    %97 = vector.extract_strided_slice %94 {offsets = [0, 0], sizes = [8, 8], strides = [1, 1]} : vector<8x32xf32> to vector<8x8xf32>
    %cst_33 = arith.constant dense<0.000000e+00> : vector<8x8xf32>
    %98 = tpu.matmul %96, %97, %cst_33 {dimension_numbers = #tpu.dot_dimension_numbers<[1], [1], [0], [0], [0, 0, 1, 0], [], []>} : vector<8x8xf32>, vector<8x8xf32>, vector<8x8xf32> -> vector<8x8xf32>
    %cst_34 = arith.constant dense<0xFF800000> : vector<8xf32>
    %99 = vector.multi_reduction <maximumf>, %98, %cst_34 [1] : vector<8x8xf32> to vector<8xf32>
    %100 = vector.shape_cast %99 : vector<8xf32> to vector<8x1xf32>
    %101 = vector.broadcast %100 : vector<8x1xf32> to vector<8x8xf32>
    %102 = arith.subf %98, %101 : vector<8x8xf32>
    %103 = math.exp %102 : vector<8x8xf32>
    %cst_35 = arith.constant dense<0.000000e+00> : vector<8xf32>
    %104 = vector.multi_reduction <add>, %103, %cst_35 [1] : vector<8x8xf32> to vector<8xf32>
    %105 = vector.shape_cast %104 : vector<8xf32> to vector<8x1xf32>
    %106 = vector.extract_strided_slice %95 {offsets = [0, 0], sizes = [8, 8], strides = [1, 1]} : vector<8x32xf32> to vector<8x8xf32>
    %cst_36 = arith.constant dense<0.000000e+00> : vector<8x8xf32>
    %107 = tpu.matmul %103, %106, %cst_36 {dimension_numbers = #tpu.dot_dimension_numbers<[1], [0], [0], [1], [0, 0, 1, 1], [], []>} : vector<8x8xf32>, vector<8x8xf32>, vector<8x8xf32> -> vector<8x8xf32>
    %108 = tpu.reciprocal %105 : vector<8x1xf32> -> vector<8x1xf32>
    %109 = vector.broadcast %108 : vector<8x1xf32> to vector<8x8xf32>
    %110 = arith.mulf %107, %109 : vector<8x8xf32>
    %c8_37 = arith.constant 8 : index
    %c0_38 = arith.constant 0 : index
    %111 = vector.load %arg7[%c8_37, %c0_38] : memref<16x32xf32, #tpu.memory_space<vmem>>, vector<8x8xf32>
    tpu.vector_store %arg7[%c8_37, %c0_38], %110 {strides = array<i32>} : memref<16x32xf32, #tpu.memory_space<vmem>>, vector<8x8xf32>,
    %112 = vector.extract_strided_slice %93 {offsets = [0, 8], sizes = [8, 8], strides = [1, 1]} : vector<8x32xf32> to vector<8x8xf32>
    %113 = vector.extract_strided_slice %94 {offsets = [0, 8], sizes = [8, 8], strides = [1, 1]} : vector<8x32xf32> to vector<8x8xf32>
    %cst_39 = arith.constant dense<0.000000e+00> : vector<8x8xf32>
    %114 = tpu.matmul %112, %113, %cst_39 {dimension_numbers = #tpu.dot_dimension_numbers<[1], [1], [0], [0], [0, 0, 1, 0], [], []>} : vector<8x8xf32>, vector<8x8xf32>, vector<8x8xf32> -> vector<8x8xf32>
    %cst_40 = arith.constant dense<0xFF800000> : vector<8xf32>
    %115 = vector.multi_reduction <maximumf>, %114, %cst_40 [1] : vector<8x8xf32> to vector<8xf32>
    %116 = vector.shape_cast %115 : vector<8xf32> to vector<8x1xf32>
    %117 = vector.broadcast %116 : vector<8x1xf32> to vector<8x8xf32>
    %118 = arith.subf %114, %117 : vector<8x8xf32>
    %119 = math.exp %118 : vector<8x8xf32>
    %cst_41 = arith.constant dense<0.000000e+00> : vector<8xf32>
    %120 = vector.multi_reduction <add>, %119, %cst_41 [1] : vector<8x8xf32> to vector<8xf32>
    %121 = vector.shape_cast %120 : vector<8xf32> to vector<8x1xf32>
    %122 = vector.extract_strided_slice %95 {offsets = [0, 8], sizes = [8, 8], strides = [1, 1]} : vector<8x32xf32> to vector<8x8xf32>
    %cst_42 = arith.constant dense<0.000000e+00> : vector<8x8xf32>
    %123 = tpu.matmul %119, %122, %cst_42 {dimension_numbers = #tpu.dot_dimension_numbers<[1], [0], [0], [1], [0, 0, 1, 1], [], []>} : vector<8x8xf32>, vector<8x8xf32>, vector<8x8xf32> -> vector<8x8xf32>
    %124 = tpu.reciprocal %121 : vector<8x1xf32> -> vector<8x1xf32>
    %125 = vector.broadcast %124 : vector<8x1xf32> to vector<8x8xf32>
    %126 = arith.mulf %123, %125 : vector<8x8xf32>
    %c8_43 = arith.constant 8 : index
    %c8_44 = arith.constant 8 : index
    %127 = vector.load %arg7[%c8_43, %c8_44] : memref<16x32xf32, #tpu.memory_space<vmem>>, vector<8x8xf32>
    tpu.vector_store %arg7[%c8_43, %c8_44], %126 {strides = array<i32>} : memref<16x32xf32, #tpu.memory_space<vmem>>, vector<8x8xf32>,
    %128 = vector.extract_strided_slice %93 {offsets = [0, 16], sizes = [8, 8], strides = [1, 1]} : vector<8x32xf32> to vector<8x8xf32>
    %129 = vector.extract_strided_slice %94 {offsets = [0, 16], sizes = [8, 8], strides = [1, 1]} : vector<8x32xf32> to vector<8x8xf32>
    %cst_45 = arith.constant dense<0.000000e+00> : vector<8x8xf32>
    %130 = tpu.matmul %128, %129, %cst_45 {dimension_numbers = #tpu.dot_dimension_numbers<[1], [1], [0], [0], [0, 0, 1, 0], [], []>} : vector<8x8xf32>, vector<8x8xf32>, vector<8x8xf32> -> vector<8x8xf32>
    %cst_46 = arith.constant dense<0xFF800000> : vector<8xf32>
    %131 = vector.multi_reduction <maximumf>, %130, %cst_46 [1] : vector<8x8xf32> to vector<8xf32>
    %132 = vector.shape_cast %131 : vector<8xf32> to vector<8x1xf32>
    %133 = vector.broadcast %132 : vector<8x1xf32> to vector<8x8xf32>
    %134 = arith.subf %130, %133 : vector<8x8xf32>
    %135 = math.exp %134 : vector<8x8xf32>
    %cst_47 = arith.constant dense<0.000000e+00> : vector<8xf32>
    %136 = vector.multi_reduction <add>, %135, %cst_47 [1] : vector<8x8xf32> to vector<8xf32>
    %137 = vector.shape_cast %136 : vector<8xf32> to vector<8x1xf32>
    %138 = vector.extract_strided_slice %95 {offsets = [0, 16], sizes = [8, 8], strides = [1, 1]} : vector<8x32xf32> to vector<8x8xf32>
    %cst_48 = arith.constant dense<0.000000e+00> : vector<8x8xf32>
    %139 = tpu.matmul %135, %138, %cst_48 {dimension_numbers = #tpu.dot_dimension_numbers<[1], [0], [0], [1], [0, 0, 1, 1], [], []>} : vector<8x8xf32>, vector<8x8xf32>, vector<8x8xf32> -> vector<8x8xf32>
    %140 = tpu.reciprocal %137 : vector<8x1xf32> -> vector<8x1xf32>
    %141 = vector.broadcast %140 : vector<8x1xf32> to vector<8x8xf32>
    %142 = arith.mulf %139, %141 : vector<8x8xf32>
    %c8_49 = arith.constant 8 : index
    %c16_50 = arith.constant 16 : index
    %143 = vector.load %arg7[%c8_49, %c16_50] : memref<16x32xf32, #tpu.memory_space<vmem>>, vector<8x8xf32>
    tpu.vector_store %arg7[%c8_49, %c16_50], %142 {strides = array<i32>} : memref<16x32xf32, #tpu.memory_space<vmem>>, vector<8x8xf32>,
    %144 = vector.extract_strided_slice %93 {offsets = [0, 24], sizes = [8, 8], strides = [1, 1]} : vector<8x32xf32> to vector<8x8xf32>
    %145 = vector.extract_strided_slice %94 {offsets = [0, 24], sizes = [8, 8], strides = [1, 1]} : vector<8x32xf32> to vector<8x8xf32>
    %cst_51 = arith.constant dense<0.000000e+00> : vector<8x8xf32>
    %146 = tpu.matmul %144, %145, %cst_51 {dimension_numbers = #tpu.dot_dimension_numbers<[1], [1], [0], [0], [0, 0, 1, 0], [], []>} : vector<8x8xf32>, vector<8x8xf32>, vector<8x8xf32> -> vector<8x8xf32>
    %cst_52 = arith.constant dense<0xFF800000> : vector<8xf32>
    %147 = vector.multi_reduction <maximumf>, %146, %cst_52 [1] : vector<8x8xf32> to vector<8xf32>
    %148 = vector.shape_cast %147 : vector<8xf32> to vector<8x1xf32>
    %149 = vector.broadcast %148 : vector<8x1xf32> to vector<8x8xf32>
    %150 = arith.subf %146, %149 : vector<8x8xf32>
    %151 = math.exp %150 : vector<8x8xf32>
    %cst_53 = arith.constant dense<0.000000e+00> : vector<8xf32>
    %152 = vector.multi_reduction <add>, %151, %cst_53 [1] : vector<8x8xf32> to vector<8xf32>
    %153 = vector.shape_cast %152 : vector<8xf32> to vector<8x1xf32>
    %154 = vector.extract_strided_slice %95 {offsets = [0, 24], sizes = [8, 8], strides = [1, 1]} : vector<8x32xf32> to vector<8x8xf32>
    %cst_54 = arith.constant dense<0.000000e+00> : vector<8x8xf32>
    %155 = tpu.matmul %151, %154, %cst_54 {dimension_numbers = #tpu.dot_dimension_numbers<[1], [0], [0], [1], [0, 0, 1, 1], [], []>} : vector<8x8xf32>, vector<8x8xf32>, vector<8x8xf32> -> vector<8x8xf32>
    %156 = tpu.reciprocal %153 : vector<8x1xf32> -> vector<8x1xf32>
    %157 = vector.broadcast %156 : vector<8x1xf32> to vector<8x8xf32>
    %158 = arith.mulf %155, %157 : vector<8x8xf32>
    %c8_55 = arith.constant 8 : index
    %c24_56 = arith.constant 24 : index
    %159 = vector.load %arg7[%c8_55, %c24_56] : memref<16x32xf32, #tpu.memory_space<vmem>>, vector<8x8xf32>
    tpu.vector_store %arg7[%c8_55, %c24_56], %158 {strides = array<i32>} : memref<16x32xf32, #tpu.memory_space<vmem>>, vector<8x8xf32>,
    %c0_57 = arith.constant 0 : index
    %c0_58 = arith.constant 0 : index
    %160 = vector.load %arg7[%c0_57, %c0_58] : memref<16x32xf32, #tpu.memory_space<vmem>>, vector<16x32xf32>
    %c0_59 = arith.constant 0 : index
    %c0_60 = arith.constant 0 : index
    %161 = vector.load %arg5[%c0_59, %c0_60] : memref<32x32xf32, #tpu.memory_space<vmem>>, vector<32x32xf32>
    %cst_61 = arith.constant dense<0.000000e+00> : vector<16x32xf32>
    %162 = tpu.matmul %160, %161, %cst_61 {dimension_numbers = #tpu.dot_dimension_numbers<[1], [0], [0], [1], [0, 0, 1, 1], [], []>} : vector<16x32xf32>, vector<32x32xf32>, vector<16x32xf32> -> vector<16x32xf32>
    %c0_62 = arith.constant 0 : index
    %c0_63 = arith.constant 0 : index
    %163 = vector.load %arg6[%c0_62, %c0_63] : memref<16x32xf32, #tpu.memory_space<vmem>>, vector<16x32xf32>
    tpu.vector_store %arg6[%c0_62, %c0_63], %162 {strides = array<i32>} : memref<16x32xf32, #tpu.memory_space<vmem>>, vector<16x32xf32>,
    return
  }
  func.func @transform_0(%arg0: i32) -> (i32, i32) {
    %c0_i32 = arith.constant 0 : i32
    %c0_i32_0 = arith.constant 0 : i32
    %c0_i32_1 = arith.constant 0 : i32
    return %c0_i32, %c0_i32_0 : i32, i32
  }
  func.func @transform_1(%arg0: i32) -> (i32, i32) {
    %c0_i32 = arith.constant 0 : i32
    %c0_i32_0 = arith.constant 0 : i32
    %c0_i32_1 = arith.constant 0 : i32
    return %c0_i32, %c0_i32_0 : i32, i32
  }
  func.func @transform_2(%arg0: i32) -> (i32, i32) {
    %c0_i32 = arith.constant 0 : i32
    %c0_i32_0 = arith.constant 0 : i32
    %c0_i32_1 = arith.constant 0 : i32
    return %c0_i32, %c0_i32_0 : i32, i32
  }
  func.func @transform_3(%arg0: i32) -> (i32, i32) {
    %c0_i32 = arith.constant 0 : i32
    %c0_i32_0 = arith.constant 0 : i32
    %c0_i32_1 = arith.constant 0 : i32
    return %c0_i32, %c0_i32_0 : i32, i32
  }
  func.func @transform_4(%arg0: i32) -> (i32, i32) {
    %c0_i32 = arith.constant 0 : i32
    %c0_i32_0 = arith.constant 0 : i32
    %c0_i32_1 = arith.constant 0 : i32
    return %c0_i32, %c0_i32_0 : i32, i32
  }
  func.func @transform_5(%arg0: i32) -> (i32, i32) {
    %c0_i32 = arith.constant 0 : i32
    %c0_i32_0 = arith.constant 0 : i32
    %c0_i32_1 = arith.constant 0 : i32
    return %c0_i32, %c0_i32_0 : i32, i32
  }
}

</mosaic_0001>

<bundles_post_ra>
// kernel: tpu_custom_call.1
= control target key start
LH: loop header
LB: loop body
LE: loop exit
PB: predicated region body
PF: predicated region fallthrough
CT: control target
= control target key end

     0   :  { %10 = vsyncpa [#allocation4], 0  ;;  %s2288_s0 = inlined_call_operand.hbm [shape: f32[16,32], index: 0, kind: input, shape index: {}]   ;;  %s2289_s1 = inlined_call_operand.vmem [shape: f32[1,32], index: 1, kind: input, shape index: {}]   ;;  %s2290_s2 = inlined_call_operand.vmem [shape: f32[1,32], index: 2, kind: input, shape index: {}]   ;;  %s2291_s3 = inlined_call_operand.hbm [shape: f32[32,96], index: 3, kind: input, shape index: {}]   ;;  %s2292_s4 = inlined_call_operand.hbm [shape: f32[32,32], index: 4, kind: input, shape index: {}]   ;;  %s2293_s5 = inlined_call_operand.hbm [shape: f32[16,32], index: 5, kind: output, shape index: {}]  }
   0x1   :  { %11 = vsyncpa [#allocation7], 0 }
   0x2   :  { %12 = vsyncpa [#allocation5], 0  ;;  %s1997_s18 = smov [#allocation6]   ;;  %s1998_s20 = smov [#allocation3]  }
   0x3   :  { %s34_s19 = sshll.u32 %s1997_s18, 4  ;;  %s18_s21 = sshll.u32 %s1998_s20, 4  ;;  %s35_s19 = int_to_ptr.vmem [resolvable:$true] %s34_s19  ;;  %s2048_s21 = int_to_ptr.vmem [resolvable:$true] %s18_s21 }
   0x4   :  { %s1903_s24 = scalar_lea.hbm %s2291_s3, 512 }
   0x5   :  { %p1904_p0 = scmp.ne.s32.totalorder %s2291_s3, %s1903_s24  ;;  %p1907_p1 = scmp.lt.u32.totalorder %s1903_s24, %s2291_s3 }
   0x7   :  { %p1909_p2 = pnand %p1907_p1, %p1904_p0 }
   0x9   :  { %1912 = shalt.err (!%p1909_p2)
}
   0xa   :  { %s1913_s29 = scalar_lea.vmem %s35_s19, 512  ;;  %p1918_p4 = scmp.lt.s32.totalorder %s35_s19, %s35_s19 }
   0xb   :  { %p1914_p3 = scmp.ne.s32.totalorder %s35_s19, %s1913_s29  ;;  %p1919_p5 = scmp.lt.s32.totalorder %s1913_s29, %s1913_s29 }
   0xd   :  { %p1920_p6 = por %p1919_p5, %p1918_p4 }
   0xf   :  { %p1921_p7 = pnand %p1920_p6, %p1914_p3 }
  0x11   :  { %1924 = shalt.err (!%p1921_p7)
}
  0x12   :  { %s1999_s30 = smov 128   ;;  %s2000_s6 = smov 8  }
  0x13   :  { %40 = dma.hbm_to_vmem [thread:$0]  %s2291_s3, 512, %s35_s19, [#allocation7], %s1999_s30, %s1999_s30, %s2000_s6  }
  0x14   :  { %s1925_s11 = scalar_lea.hbm %s2288_s0, 256 }
  0x15   :  { %p1926_p8 = scmp.ne.s32.totalorder %s2288_s0, %s1925_s11  ;;  %p1929_p9 = scmp.lt.u32.totalorder %s1925_s11, %s2288_s0 }
  0x17   :  { %p1931_p10 = pnand %p1929_p9, %p1926_p8 }
  0x19   :  { %1934 = shalt.err (!%p1931_p10)
}
  0x1a   :  { %s1935_s16 = scalar_lea.vmem %s2048_s21, 256  ;;  %p1940_p12 = scmp.lt.s32.totalorder %s2048_s21, %s2048_s21 }
  0x1b   :  { %p1936_p11 = scmp.ne.s32.totalorder %s2048_s21, %s1935_s16  ;;  %p1941_p13 = scmp.lt.s32.totalorder %s1935_s16, %s1935_s16 }
  0x1d   :  { %p1942_p0 = por %p1941_p13, %p1940_p12 }
  0x1f   :  { %p1943_p1 = pnand %p1942_p0, %p1936_p11 }
  0x21   :  { %1946 = shalt.err (!%p1943_p1)
}
  0x22   :  { %24 = dma.hbm_to_vmem [thread:$0]  %s2288_s0, 256, %s2048_s21, [#allocation4], %s1999_s30, %s1999_s30, %s2000_s6  }
  0x23   :  { %s2001_s18 = smov [#allocation8]   ;;  %s1947_s23 = scalar_lea.hbm %s2292_s4, 512 }
  0x24   :  { %s46_s19 = sshll.u32 %s2001_s18, 4  ;;  %p1948_p2 = scmp.ne.s32.totalorder %s2292_s4, %s1947_s23  ;;  %s47_s19 = int_to_ptr.vmem [resolvable:$true] %s46_s19 }
  0x25   :  { %p1951_p3 = scmp.lt.u32.totalorder %s1947_s23, %s2292_s4 }
  0x27   :  { %p1953_p4 = pnand %p1951_p3, %p1948_p2 }
  0x29   :  { %1956 = shalt.err (!%p1953_p4)
}
  0x2a   :  { %s1957_s28 = scalar_lea.vmem %s47_s19, 512  ;;  %p1962_p6 = scmp.lt.s32.totalorder %s47_s19, %s47_s19 }
  0x2b   :  { %p1958_p5 = scmp.ne.s32.totalorder %s47_s19, %s1957_s28  ;;  %p1963_p7 = scmp.lt.s32.totalorder %s1957_s28, %s1957_s28 }
  0x2d   :  { %p1964_p8 = por %p1963_p7, %p1962_p6 }
  0x2f   :  { %p1965_p9 = pnand %p1964_p8, %p1958_p5 }
  0x31   :  { %1968 = shalt.err (!%p1965_p9)
}
  0x32   :  { %52 = dma.hbm_to_vmem [thread:$0]  %s2292_s4, 512, %s47_s19, [#allocation7], %s1999_s30, %s1999_s30, %s2000_s6  }
  0x33   :  { %1991 = dma.done.wait [#allocation4], 256  }
  0x34   :  { %1992 = vsyncadd [#allocation4], 4294967040 }
  0x35   :  { %1993 = dma.done.wait [#allocation7], 1024  }
  0x36   :  { %1994 = vsyncadd [#allocation7], 4294966272  ;;  %vm64_vm0 = vcmask 261120   ;;  %v111_v0 = vld [vmem:[#allocation6] sm:$0xff]  ;;  %v112_v1 = vld [vmem:[#allocation6 + $0x8] sm:$0xff]  ;;  %v95_v33 = vlaneseq  ;;  %v2002_v45 = vmov 0.0  }
  0x37   :  { %v113_v2 = vld [vmem:[#allocation6 + $0x10] sm:$0xff]  ;;  %v1832_v3 = vpack.c.bf16 %v112_v1, %v111_v0  ;;  %v114_v4 = vld [vmem:[#allocation6 + $0x18] sm:$0xff]  ;;  %v90_v35 = vld [vmem:[%s2289_s1] sm:$0x1]  ;;  %1741 = vmatprep.subr.mxu1 %v2002_v45  ;;  %vm2003_vm1 = vmmov 0   ;;  %s2004_s1 = smov 64  }
  0x38   :  { %v62_v5 = vld [vmem:[#allocation3] sm:$0xff]  ;;  %v63_v6 = vld [vmem:[#allocation3 + $0x8] sm:$0xff]  ;;  %v1836_v7 = vpack.c.bf16 %v114_v4, %v113_v2  ;;  %v96_v34 = vshrl.u32 %v95_v33, 7  ;;  %v1657_v40 = vld [vmem:[%s2290_s2] ss:$0 sm:$0xff]  ;;  %1743 = vmatprep.mubr.msk.f32.mxu1 %vm2003_vm1, %v2002_v45  ;;  %s2005_s2 = smov 96  }
  0x39   :  { %v65_v8 = vsel %vm64_vm0, %v62_v5, 0.0  ;;  %v66_v9 = vsel %vm64_vm0, %v63_v6, 0.0  ;;  %1833 = vmatprep.subr.bf16.mxu0 %v1832_v3  ;;  %s2006_s9 = smov 88   ;;  %s2007_s10 = smov 120   ;;  %vm199_vm2 = vcmask 64512   ;;  %vm531_vm3 = vcmask 130112  }
  0x3a   :  { %v67_v10 = vadd.f32 %v66_v9, %v65_v8  ;;  %1835 = vmatpush3.bf16.msra.mxu0 %v1832_v3  ;;  %v97_v36 = vsub.s32 0, %v96_v34  ;;  %s2008_s11 = smov 80   ;;  %s2009_s12 = smov 112   ;;  %vm702_vm4 = vcmask 195712   ;;  %vm873_vm5 = vcmask 261312  }
  0x3b   :  { %1837 = vmatprep.subr.bf16.mxu0 %v1836_v7  ;;  %s2010_s13 = smov 72   ;;  %s2011_s14 = smov 104  }
  0x3c   :  { %v68_v11 = vrot.slane %v67_v10, 4  ;;  %s2012_s15 = smov 56   ;;  %s2013_s16 = smov 48  }
  0x3d   :  { %s2014_s3 = smov 40   ;;  %s2015_s17 = smov 16  }
  0x3e   :  { %v69_v12 = vadd.f32 %v68_v11, %v67_v10  ;;  %1839 = vmatpush3.bf16.msra.mxu0 %v1836_v7  ;;  %s2016_s18 = smov 24   ;;  %s2017_s19 = smov [#allocation9]  }
  0x3f   :  { %1761 = vmatprep.subr.mxu0 %v2002_v45  ;;  %s1644_s20 = sshll.u32 %s2017_s19, 4  ;;  %s1645_s20 = int_to_ptr.vmem [resolvable:$true] %s1644_s20 }
  0x40   :  { %v70_v13 = vrot.slane %v69_v12, 2  ;;  %s1969_s22 = scalar_lea.vmem %s1645_s20, 256  ;;  %p1974_p11 = scmp.lt.s32.totalorder %s1645_s20, %s1645_s20 }
  0x41   :  { %p1970_p10 = scmp.ne.s32.totalorder %s1645_s20, %s1969_s22  ;;  %p1975_p12 = scmp.lt.s32.totalorder %s1969_s22, %s1969_s22 }
  0x42   :  { %v71_v14 = vadd.f32 %v70_v13, %v69_v12 }
  0x43   :  { %p1976_p13 = por %p1975_p12, %p1974_p11 }
  0x44   :  { %v72_v15 = vrot.slane %v71_v14, 1 }
  0x45   :  { %p1977_p0 = pnand %p1976_p13, %p1970_p10 }
  0x46   :  { %v73_v16 = vadd.f32 %v72_v15, %v71_v14 }
  0x48   :  { %v75_v17 = vmul.f32 0.0625, %v73_v16 }
  0x4a   :  { %v76_v18 = vsub.f32 %v62_v5, %v75_v17  ;;  %v77_v19 = vsub.f32 %v63_v6, %v75_v17 }
  0x4c   :  { %v78_v20 = vmul.f32 %v76_v18, %v76_v18  ;;  %v79_v21 = vmul.f32 %v77_v19, %v77_v19 }
  0x4e   :  { %v80_v22 = vsel %vm64_vm0, %v78_v20, 0.0  ;;  %v81_v23 = vsel %vm64_vm0, %v79_v21, 0.0 }
  0x4f   :  { %v82_v24 = vadd.f32 %v81_v23, %v80_v22 }
  0x51   :  { %v83_v25 = vrot.slane %v82_v24, 4 }
  0x53   :  { %v84_v26 = vadd.f32 %v83_v25, %v82_v24 }
  0x55   :  { %v85_v27 = vrot.slane %v84_v26, 2 }
  0x57   :  { %v86_v28 = vadd.f32 %v85_v27, %v84_v26 }
  0x59   :  { %v87_v29 = vrot.slane %v86_v28, 1 }
  0x5b   :  { %v88_v30 = vadd.f32 %v87_v29, %v86_v28 }
  0x5d   :  { %v89_v31 = vmul.f32 0.0625, %v88_v30 }
  0x5f   :  { %v91_v32 = vadd.f32 1e-05, %v89_v31 }
  0x61   :  { %1869 = vrsqrt.f32 %v91_v32 }
  0x6b   :  { %v1870_v37 = vpop.eup %1869 }
  0x6c   :  { %v93_v38 = vmul.f32 %v1870_v37, %v90_v35 }
  0x6e   :  { %v98_v39 = vrot.slane %v93_v38, %v97_v36 }
  0x70   :  { %v100_v41 = vmul.f32 %v98_v39, %v76_v18  ;;  %v101_v42 = vmul.f32 %v98_v39, %v77_v19 }
  0x72   :  { %v109_v43 = vadd.f32 %v1657_v40, %v100_v41  ;;  %v110_v44 = vadd.f32 %v1657_v40, %v101_v42 }
  0x74   :  { %1738 = vmatprep.mubr.msk.f32.mxu0 %vm64_vm0, %v109_v43 }
  0x75   :  { %1739 = vmatmul.mubr.msk.f32.vlgmr.msra.gmra.mrb[0].mxu0 %vm64_vm0, %v110_v44 }
  0x76   :  { %1763 = vmatprep.mubr.msk.f32.mxu0 %vm2003_vm1, %v2002_v45 }
 0x148   :  { %v2118_v46 = vpop.f32.mrb[0].mxu0 }
 0x149   :  { %v2120_v47 = vpop.f32.mrb[1].mxu0 }
 0x14a   :  { %283 = vrot.lane.b32.xlu1 %v2120_v47, %s2004_s1  ;;  %197 = vrot.lane.b32.xlu0 %v2120_v47, %s2005_s2 }
 0x14e   :  { %364 = vrot.lane.b32.xlu1 %v2120_v47, %s2006_s9 }
 0x152   :  { %362 = vrot.lane.b32.xlu1 %v2120_v47, %s2007_s10 }
 0x156   :  { %535 = vrot.lane.b32.xlu1 %v2120_v47, %s2008_s11 }
 0x15a   :  { %533 = vrot.lane.b32.xlu1 %v2120_v47, %s2009_s12 }
 0x15e   :  { %706 = vrot.lane.b32.xlu1 %v2120_v47, %s2010_s13 }
 0x162   :  { %704 = vrot.lane.b32.xlu1 %v2120_v47, %s2011_s14 }
 0x166   :  { %876 = vrot.lane.b32.xlu1 %v2118_v46, %s2005_s2 }
 0x16a   :  { %1042 = vrot.lane.b32.xlu1 %v2118_v46, %s2006_s9 }
 0x16e   :  { %1212 = vrot.lane.b32.xlu1 %v2118_v46, %s2008_s11 }
 0x172   :  { %1210 = vrot.lane.b32.xlu1 %v2118_v46, %s2009_s12 }
 0x176   :  { %1382 = vrot.lane.b32.xlu1 %v2118_v46, %s2010_s13 }
 0x17a   :  { %1380 = vrot.lane.b32.xlu1 %v2118_v46, %s2011_s14 }
 0x17e   :  { %449 = vrot.lane.b32.xlu1 %v2120_v47, %s2012_s15 }
 0x1bc   :  { %v284_v48 = vpop.permute.xlu1 %283  ;;  %v198_v49 = vpop.permute.xlu0 %197 }
 0x1bd   :  { %1742 = vmatpush3.xpose.msk.msra.mxu1 %vm199_vm2, %v198_v49 }
 0x1be   :  { %1746 = vmatprep.subr.mxu1 %v2002_v45 }
 0x1c0   :  { %v2142_v50 = vpop.permute.xlu1 %364  ;;  %1744 = vmatmul.mubr.msk.f32.vlgmr.msra.gmra.mrb[0].mxu1 %vm199_vm2, %v2120_v47 }
 0x1c1   :  { %1747 = vmatpush3.msra.mxu1 %v284_v48  ;;  %1748 = vmatprep.mubr.msk.f32.mxu1 %vm2003_vm1, %v2002_v45 }
 0x1c2   :  { %1751 = vmatprep.subr.mxu1 %v2002_v45 }
 0x1c4   :  { %v2149_v51 = vpop.permute.xlu1 %362 }
 0x1c8   :  { %v536_v52 = vpop.permute.xlu1 %535 }
 0x1c9   :  { %1762 = vmatpush3.xpose.msk.msra.mxu0 %vm199_vm2, %v536_v52 }
 0x1ca   :  { %1771 = vmatprep.subr.mxu0 %v2002_v45 }
 0x1cc   :  { %v534_v53 = vpop.permute.xlu1 %533 }
 0x1cd   :  { %1764 = vmatmul.mubr.msk.f32.vlgmr.msra.gmra.mrb[2].mxu0 %vm199_vm2, %v534_v53 }
 0x1ce   :  { %1773 = vmatprep.mubr.msk.f32.mxu0 %vm2003_vm1, %v2002_v45 }
 0x1d0   :  { %v707_v54 = vpop.permute.xlu1 %706 }
 0x1d1   :  { %1772 = vmatpush3.xpose.msk.msra.mxu0 %vm199_vm2, %v707_v54 }
 0x1d2   :  { %1781 = vmatprep.subr.mxu0 %v2002_v45 }
 0x1d4   :  { %v705_v55 = vpop.permute.xlu1 %704 }
 0x1d5   :  { %1774 = vmatmul.mubr.msk.f32.vlgmr.msra.gmra.mrb[4].mxu0 %vm199_vm2, %v705_v55 }
 0x1d6   :  { %1783 = vmatprep.mubr.msk.f32.mxu0 %vm2003_vm1, %v2002_v45 }
 0x1d8   :  { %v877_v56 = vpop.permute.xlu1 %876 }
 0x1d9   :  { %1782 = vmatpush3.xpose.msk.msra.mxu0 %vm199_vm2, %v877_v56 }
 0x1da   :  { %1791 = vmatprep.subr.mxu0 %v2002_v45 }
 0x1dc   :  { %1784 = vmatmul.mubr.msk.f32.vlgmr.msra.gmra.mrb[6].mxu0 %vm199_vm2, %v2118_v46  ;;  %v1043_v57 = vpop.permute.xlu1 %1042 }
 0x1dd   :  { %1792 = vmatpush3.xpose.msk.msra.mxu0 %vm199_vm2, %v1043_v57  ;;  %1793 = vmatprep.mubr.msk.f32.mxu0 %vm2003_vm1, %v2002_v45 }
 0x1de   :  { %1801 = vmatprep.subr.mxu0 %v2002_v45 }
 0x1e0   :  { %v1213_v6 = vpop.permute.xlu1 %1212 }
 0x1e4   :  { %v1211_v7 = vpop.permute.xlu1 %1210 }
 0x1e8   :  { %v1383_v12 = vpop.permute.xlu1 %1382 }
 0x1ec   :  { %v1381_v13 = vpop.permute.xlu1 %1380 }
 0x1f0   :  { %v450_v15 = vpop.permute.xlu1 %449 }
 0x293   :  { %v270_v58 = vpop.f32.mrb[0].mxu1 }
 0x294   :  { %v1745_v59 = vpop.f32.mrb[1].mxu1  ;;  %v274_v60 = vsel %vm199_vm2, %v270_v58, -inf }
 0x295   :  { %275 = vmax.xlane.f32.xlu0 %v274_v60 }
 0x2a0   :  { %v2170_v61 = vpop.f32.mrb[2].mxu0 }
 0x2a1   :  { %v1765_v62 = vpop.f32.mrb[3].mxu0  ;;  %v611_v4 = vsel %vm199_vm2, %v2170_v61, -inf }
 0x2a8   :  { %v2172_v63 = vpop.f32.mrb[4].mxu0 }
 0x2a9   :  { %v1775_v0 = vpop.f32.mrb[5].mxu0  ;;  %v782_v5 = vsel %vm199_vm2, %v2172_v63, -inf }
 0x2ab   :  { %1040 = vrot.lane.b32.xlu0 %v2118_v46, %s2007_s10 }
 0x2af   :  { %v2176_v1 = vpop.f32.mrb[6].mxu0 }
 0x2b0   :  { %v1785_v2 = vpop.f32.mrb[7].mxu0  ;;  %v952_v3 = vsel %vm199_vm2, %v2176_v1, -inf }
 0x2b1   :  { %953 = vmax.xlane.f32.xlu1 %v952_v3 }
 0x2ca   :  { %612 = vmax.xlane.f32.xlu0 %v611_v4 }
 0x2ce   :  { %783 = vmax.xlane.f32.xlu0 %v782_v5 }
 0x2e4   :  { %620 = vrot.lane.b32.xlu0 %v2120_v47, %s2013_s16 }
 0x322   :  { %v276_v8 = vpop.xlane.xlu0 %275 }
 0x323   :  { %v277_v9 = vsub.f32 %v270_v58, %v276_v8 }
 0x325   :  { %v278_v10 = vmul.f32 1.442695, %v277_v9 }
 0x326   :  { %v1041_v11 = vpop.permute.xlu0 %1040 }
 0x327   :  { %1871 = vpow2.f32 %v278_v10  ;;  %1794 = vmatmul.mubr.msk.f32.vlgmr.msra.gmra.mrb[8].mxu0 %vm199_vm2, %v1041_v11 }
 0x328   :  { %1802 = vmatpush3.xpose.msk.msra.mxu0 %vm199_vm2, %v1213_v6  ;;  %1803 = vmatprep.mubr.msk.f32.mxu0 %vm2003_vm1, %v2002_v45 }
 0x329   :  { %1811 = vmatprep.subr.mxu0 %v2002_v45 }
 0x32b   :  { %1804 = vmatmul.mubr.msk.f32.vlgmr.msra.gmra.mrb[10].mxu0 %vm199_vm2, %v1211_v7 }
 0x32c   :  { %1812 = vmatpush3.xpose.msk.msra.mxu0 %vm199_vm2, %v1383_v12  ;;  %1813 = vmatprep.mubr.msk.f32.mxu0 %vm2003_vm1, %v2002_v45 }
 0x32f   :  { %1814 = vmatmul.mubr.msk.f32.vlgmr.msra.gmra.mrb[12].mxu0 %vm199_vm2, %v1381_v13 }
 0x331   :  { %v2196_v14 = vpop.eup %1871 }
 0x332   :  { %1749 = vmatmul.mubr.msk.f32.vlgmr.msra.gmra.mrb[2].mxu1 %vm199_vm2, %v2196_v14  ;;  %v280_v5 = vsel %vm199_vm2, %v2196_v14, 0.0 }
 0x333   :  { %1752 = vmatpush3.xpose.msk.msra.mxu1 %vm199_vm2, %v2142_v50  ;;  %1753 = vmatprep.mubr.msk.f32.mxu1 %vm2003_vm1, %v2002_v45 }
 0x334   :  { %1756 = vmatprep.subr.mxu1 %v2002_v45 }
 0x336   :  { %1754 = vmatmul.mubr.msk.f32.vlgmr.msra.gmra.mrb[4].mxu1 %vm199_vm2, %v2149_v51 }
 0x337   :  { %1757 = vmatpush3.msra.mxu1 %v450_v15  ;;  %1758 = vmatprep.mubr.msk.f32.mxu1 %vm2003_vm1, %v2002_v45 }
 0x338   :  { %1766 = vmatprep.subr.mxu1 %v2002_v45 }
 0x33e   :  { %v954_v42 = vpop.xlane.xlu1 %953 }
 0x33f   :  { %v955_v43 = vsub.f32 %v2176_v1, %v954_v42 }
 0x357   :  { %v613_v30 = vpop.xlane.xlu0 %612 }
 0x358   :  { %v614_v31 = vsub.f32 %v2170_v61, %v613_v30 }
 0x35a   :  { %v615_v32 = vmul.f32 1.442695, %v614_v31 }
 0x35b   :  { %v784_v35 = vpop.xlane.xlu0 %783 }
 0x35c   :  { %1873 = vpow2.f32 %v615_v32  ;;  %v785_v37 = vsub.f32 %v2172_v63, %v784_v35  ;;  %v1552_v32 = vld [vmem:[#allocation8] sm:$0xff] }
 0x35e   :  { %v786_v40 = vmul.f32 1.442695, %v785_v37  ;;  %v1554_v37 = vld [vmem:[#allocation8 + $0x10] sm:$0xff] }
 0x35f   :  { %v621_v36 = vpop.permute.xlu0 %620 }
 0x366   :  { %v1874_v33 = vpop.eup %1873 }
 0x367   :  { %v617_v34 = vsel %vm199_vm2, %v1874_v33, 0.0 }
 0x3fa   :  { %v1114_v16 = vpop.f32.mrb[8].mxu0 }
 0x3fb   :  { %v1795_v17 = vpop.f32.mrb[9].mxu0  ;;  %v1118_v18 = vsel %vm199_vm2, %v1114_v16, -inf }
 0x3fc   :  { %1119 = vmax.xlane.f32.xlu0 %v1118_v18 }
 0x3fe   :  { %v1284_v19 = vpop.f32.mrb[10].mxu0 }
 0x3ff   :  { %v1805_v20 = vpop.f32.mrb[11].mxu0  ;;  %v1288_v21 = vsel %vm199_vm2, %v1284_v19, -inf }
 0x400   :  { %1289 = vmax.xlane.f32.xlu1 %v1288_v21 }
 0x402   :  { %v1454_v22 = vpop.f32.mrb[12].mxu0 }
 0x403   :  { %v1815_v23 = vpop.f32.mrb[13].mxu0  ;;  %v1458_v24 = vsel %vm199_vm2, %v1454_v22, -inf }
 0x404   :  { %1459 = vmax.xlane.f32.xlu0 %v1458_v24 }
 0x405   :  { %v2213_v25 = vpop.f32.mrb[2].mxu1 }
 0x406   :  { %v1750_v26 = vpop.f32.mrb[3].mxu1 }
 0x409   :  { %v436_v27 = vpop.f32.mrb[4].mxu1 }
 0x40a   :  { %v1755_v28 = vpop.f32.mrb[5].mxu1  ;;  %v440_v29 = vsel %vm199_vm2, %v436_v27, -inf }
 0x40b   :  { %441 = vmax.xlane.f32.xlu1 %v440_v29 }
 0x41a   :  { %1297 = vrot.lane.b32.xlu0 %v2118_v46, %s2013_s16 }
 0x41c   :  { %791 = vrot.lane.b32.xlu1 %v2120_v47, %s2014_s3  ;;  %v956_v47 = vmul.f32 1.442695, %v955_v43 }
 0x420   :  { %961 = vrot.lane.b32.xlu1 %v2118_v46, %s2004_s1 }
 0x424   :  { %1127 = vrot.lane.b32.xlu1 %v2118_v46, %s2012_s15 }
 0x428   :  { %1467 = vrot.lane.b32.xlu1 %v2118_v46, %s2014_s3 }
 0x44c   :  { %618 = vadd.xlane.f32.xlu1 %v617_v34 }
 0x489   :  { %v1120_v38 = vpop.xlane.xlu0 %1119 }
 0x48a   :  { %v1121_v39 = vsub.f32 %v1114_v16, %v1120_v38  ;;  %v1555_v38 = vld [vmem:[#allocation8 + $0x18] sm:$0xff] }
 0x48c   :  { %v1122_v41 = vmul.f32 1.442695, %v1121_v39  ;;  %v1844_v39 = vpack.c.bf16 %v1555_v38, %v1554_v37 }
 0x48d   :  { %v1290_v48 = vpop.xlane.xlu1 %1289 }
 0x48e   :  { %1875 = vpow2.f32 %v1122_v41  ;;  %v1291_v50 = vsub.f32 %v1284_v19, %v1290_v48 }
 0x48f   :  { %1877 = vpow2.f32 %v786_v40 }
 0x490   :  { %v1292_v56 = vmul.f32 1.442695, %v1291_v50 }
 0x491   :  { %v1460_v44 = vpop.xlane.xlu0 %1459 }
 0x492   :  { %v1461_v46 = vsub.f32 %v1454_v22, %v1460_v44 }
 0x494   :  { %v1462_v49 = vmul.f32 1.442695, %v1461_v46 }
 0x495   :  { %v1298_v7 = vpop.permute.xlu0 %1297 }
 0x496   :  { %1879 = vpow2.f32 %v1462_v49 }
 0x497   :  { %1881 = vpow2.f32 %v956_v47 }
 0x498   :  { %v1876_v51 = vpop.eup %1875  ;;  %v442_v52 = vpop.xlane.xlu1 %441 }
 0x499   :  { %v443_v53 = vsub.f32 %v436_v27, %v442_v52  ;;  %v1124_v54 = vsel %vm199_vm2, %v1876_v51, 0.0  ;;  %v1878_v55 = vpop.eup %1877 }
 0x49a   :  { %1125 = vadd.xlane.f32.xlu0 %v1124_v54  ;;  %v788_v58 = vsel %vm199_vm2, %v1878_v55, 0.0 }
 0x49b   :  { %v444_v57 = vmul.f32 1.442695, %v443_v53 }
 0x49c   :  { %v792_v0 = vpop.permute.xlu1 %791 }
 0x49d   :  { %1883 = vpow2.f32 %v444_v57 }
 0x49e   :  { %789 = vadd.xlane.f32.xlu0 %v788_v58  ;;  %1885 = vpow2.f32 %v1292_v56 }
 0x4a0   :  { %v1880_v59 = vpop.eup %1879  ;;  %v962_v4 = vpop.permute.xlu1 %961 }
 0x4a1   :  { %v1464_v60 = vsel %vm199_vm2, %v1880_v59, 0.0  ;;  %v1882_v61 = vpop.eup %1881 }
 0x4a2   :  { %1465 = vadd.xlane.f32.xlu1 %v1464_v60  ;;  %v958_v62 = vsel %vm199_vm2, %v1882_v61, 0.0 }
 0x4a4   :  { %v1128_v6 = vpop.permute.xlu1 %1127 }
 0x4a6   :  { %959 = vadd.xlane.f32.xlu1 %v958_v62 }
 0x4a7   :  { %v1884_v63 = vpop.eup %1883 }
 0x4a8   :  { %1759 = vmatmul.mubr.msk.f32.vlgmr.msra.gmra.mrb[6].mxu1 %vm199_vm2, %v1884_v63  ;;  %v446_v1 = vsel %vm199_vm2, %v1884_v63, 0.0  ;;  %v1886_v2 = vpop.eup %1885  ;;  %v1468_v8 = vpop.permute.xlu1 %1467 }
 0x4a9   :  { %1767 = vmatpush3.msra.mxu1 %v621_v36  ;;  %447 = vadd.xlane.f32.xlu0 %v446_v1  ;;  %v1294_v3 = vsel %vm199_vm2, %v1886_v2, 0.0 }
 0x4aa   :  { %1768 = vmatprep.mubr.msk.f32.mxu1 %vm2003_vm1, %v2002_v45  ;;  %1776 = vmatprep.subr.mxu1 %v2002_v45 }
 0x4ac   :  { %1769 = vmatmul.mubr.msk.f32.vlgmr.msra.gmra.mrb[8].mxu1 %vm199_vm2, %v1874_v33  ;;  %v1553_v33 = vld [vmem:[#allocation8 + $0x8] sm:$0xff] }
 0x4ad   :  { %1777 = vmatpush3.msra.mxu1 %v792_v0  ;;  %1295 = vadd.xlane.f32.xlu0 %v1294_v3  ;;  %v1840_v36 = vpack.c.bf16 %v1553_v33, %v1552_v32 }
 0x4ae   :  { %1778 = vmatprep.mubr.msk.f32.mxu1 %vm2003_vm1, %v2002_v45  ;;  %1786 = vmatprep.subr.mxu1 %v2002_v45 }
 0x4af   :  { %1841 = vmatprep.subr.bf16.mxu0 %v1840_v36 }
 0x4b0   :  { %1779 = vmatmul.mubr.msk.f32.vlgmr.msra.gmra.mrb[10].mxu1 %vm199_vm2, %v1878_v55  ;;  %1843 = vmatpush3.bf16.msra.mxu0 %v1840_v36 }
 0x4b1   :  { %1787 = vmatpush3.msra.mxu1 %v962_v4  ;;  %281 = vadd.xlane.f32.xlu0 %v280_v5 }
 0x4b2   :  { %1788 = vmatprep.mubr.msk.f32.mxu1 %vm2003_vm1, %v2002_v45  ;;  %1796 = vmatprep.subr.mxu1 %v2002_v45 }
 0x4b3   :  { %1845 = vmatprep.subr.bf16.mxu0 %v1844_v39 }
 0x4b4   :  { %1789 = vmatmul.mubr.msk.f32.vlgmr.msra.gmra.mrb[12].mxu1 %vm199_vm2, %v1882_v61  ;;  %1847 = vmatpush3.bf16.msra.mxu0 %v1844_v39 }
 0x4b5   :  { %1797 = vmatpush3.msra.mxu1 %v1128_v6  ;;  %1798 = vmatprep.mubr.msk.f32.mxu1 %vm2003_vm1, %v2002_v45 }
 0x4b6   :  { %1806 = vmatprep.subr.mxu1 %v2002_v45 }
 0x4b8   :  { %1799 = vmatmul.mubr.msk.f32.vlgmr.msra.gmra.mrb[14].mxu1 %vm199_vm2, %v1876_v51 }
 0x4b9   :  { %1807 = vmatpush3.msra.mxu1 %v1298_v7  ;;  %1808 = vmatprep.mubr.msk.f32.mxu1 %vm2003_vm1, %v2002_v45 }
 0x4ba   :  { %1816 = vmatprep.subr.mxu1 %v2002_v45 }
 0x4bc   :  { %1809 = vmatmul.mubr.msk.f32.vlgmr.msra.gmra.mrb[16].mxu1 %vm199_vm2, %v1886_v2 }
 0x4bd   :  { %1817 = vmatpush3.msra.mxu1 %v1468_v8  ;;  %1818 = vmatprep.mubr.msk.f32.mxu1 %vm2003_vm1, %v2002_v45 }
 0x4c0   :  { %1819 = vmatmul.mubr.msk.f32.vlgmr.msra.gmra.mrb[18].mxu1 %vm199_vm2, %v1880_v59 }
 0x4d9   :  { %v619_v16 = vpop.xlane.xlu1 %618 }
 0x527   :  { %v1126_v9 = vpop.xlane.xlu0 %1125 }
 0x52b   :  { %v790_v10 = vpop.xlane.xlu0 %789 }
 0x52f   :  { %v1466_v17 = vpop.xlane.xlu1 %1465 }
 0x533   :  { %v960_v18 = vpop.xlane.xlu1 %959 }
 0x536   :  { %v448_v11 = vpop.xlane.xlu0 %447 }
 0x53a   :  { %v1296_v12 = vpop.xlane.xlu0 %1295 }
 0x53e   :  { %v282_v13 = vpop.xlane.xlu0 %281 }
 0x53f   :  { %1887 = vrcp.f32 %v282_v13 }
 0x540   :  { %1889 = vrcp.f32 %v448_v11 }
 0x541   :  { %1891 = vrcp.f32 %v619_v16 }
 0x542   :  { %1893 = vrcp.f32 %v790_v10 }
 0x543   :  { %1895 = vrcp.f32 %v960_v18 }
 0x544   :  { %1897 = vrcp.f32 %v1126_v9 }
 0x545   :  { %1899 = vrcp.f32 %v1296_v12 }
 0x546   :  { %1901 = vrcp.f32 %v1466_v17 }
 0x549   :  { %v1888_v14 = vpop.eup %1887 }
 0x54a   :  { %v360_v15 = vmul.f32 %v1888_v14, %v2213_v25  ;;  %v1890_v45 = vpop.eup %1889 }
 0x54b   :  { %v1892_v22 = vpop.eup %1891 }
 0x54c   :  { %361 = vst.msk [vmem:[#allocation2] sm:$0xff] %vm199_vm2, %v360_v15  ;;  %v1894_v25 = vpop.eup %1893 }
 0x54d   :  { %v1896_v30 = vpop.eup %1895 }
 0x54e   :  { %v1898_v40 = vpop.eup %1897 }
 0x54f   :  { %v1900_v44 = vpop.eup %1899 }
 0x550   :  { %v1902_v49 = vpop.eup %1901 }
 0x57b   :  { %v521_v19 = vpop.f32.mrb[6].mxu1 }
 0x57c   :  { %v526_v20 = vmul.f32 %v1890_v45, %v521_v19  ;;  %v1760_v21 = vpop.f32.mrb[7].mxu1 }
 0x57e   :  { %528 = vrot.lane.b32.xlu0 %v526_v20, %s2000_s6 }
 0x57f   :  { %v692_v23 = vpop.f32.mrb[8].mxu1 }
 0x580   :  { %v697_v24 = vmul.f32 %v1892_v22, %v692_v23  ;;  %v1770_v26 = vpop.f32.mrb[9].mxu1 }
 0x582   :  { %699 = vrot.lane.b32.xlu1 %v697_v24, %s2015_s17 }
 0x583   :  { %v863_v27 = vpop.f32.mrb[10].mxu1 }
 0x584   :  { %v868_v28 = vmul.f32 %v1894_v25, %v863_v27  ;;  %v1780_v29 = vpop.f32.mrb[11].mxu1 }
 0x586   :  { %870 = vrot.lane.b32.xlu1 %v868_v28, %s2016_s18 }
 0x587   :  { %v1033_v31 = vpop.f32.mrb[12].mxu1 }
 0x588   :  { %v1038_v34 = vmul.f32 %v1896_v30, %v1033_v31  ;;  %v1790_v35 = vpop.f32.mrb[13].mxu1 }
 0x58a   :  { %1039 = vst.msk [vmem:[#allocation2 + $0x8] sm:$0xff] %vm199_vm2, %v1038_v34 }
 0x58b   :  { %v1199_v41 = vpop.f32.mrb[14].mxu1 }
 0x58c   :  { %v1204_v42 = vmul.f32 %v1898_v40, %v1199_v41  ;;  %v1800_v43 = vpop.f32.mrb[15].mxu1 }
 0x58e   :  { %1206 = vrot.lane.b32.xlu1 %v1204_v42, %s2000_s6 }
 0x58f   :  { %v1369_v46 = vpop.f32.mrb[16].mxu1 }
 0x590   :  { %v1374_v47 = vmul.f32 %v1900_v44, %v1369_v46  ;;  %v1810_v48 = vpop.f32.mrb[17].mxu1 }
 0x592   :  { %1376 = vrot.lane.b32.xlu0 %v1374_v47, %s2015_s17 }
 0x593   :  { %v1539_v50 = vpop.f32.mrb[18].mxu1 }
 0x594   :  { %v1544_v51 = vmul.f32 %v1902_v49, %v1539_v50  ;;  %v1820_v52 = vpop.f32.mrb[19].mxu1 }
 0x596   :  { %1546 = vrot.lane.b32.xlu1 %v1544_v51, %s2016_s18 }
 0x5f0   :  { %v529_v53 = vpop.permute.xlu0 %528 }
 0x5f1   :  { %532 = vst.msk [vmem:[#allocation2] sm:$0xff] %vm531_vm3, %v529_v53 }
 0x5f4   :  { %v700_v54 = vpop.permute.xlu1 %699 }
 0x5f5   :  { %703 = vst.msk [vmem:[#allocation2] sm:$0xff] %vm702_vm4, %v700_v54 }
 0x5f8   :  { %v871_v55 = vpop.permute.xlu1 %870 }
 0x5f9   :  { %874 = vst.msk [vmem:[#allocation2] sm:$0xff] %vm873_vm5, %v871_v55 }
 0x600   :  { %v1207_v56 = vpop.permute.xlu1 %1206  ;;  %v1550_v57 = vld [vmem:[#allocation2] sm:$0xff] }
 0x601   :  { %1209 = vst.msk [vmem:[#allocation2 + $0x8] sm:$0xff] %vm531_vm3, %v1207_v56  ;;  %1829 = vmatprep.mubr.msk.f32.mxu0 %vm64_vm0, %v1550_v57 }
 0x604   :  { %v1377_v58 = vpop.permute.xlu0 %1376 }
 0x605   :  { %1379 = vst.msk [vmem:[#allocation2 + $0x8] sm:$0xff] %vm702_vm4, %v1377_v58 }
 0x608   :  { %v1547_v59 = vpop.permute.xlu1 %1546 }
 0x609   :  { %1549 = vst.msk [vmem:[#allocation2 + $0x8] sm:$0xff] %vm873_vm5, %v1547_v59 }
 0x610   :  { %v1551_v60 = vld [vmem:[#allocation2 + $0x8] sm:$0xff] }
 0x611   :  { %1830 = vmatmul.mubr.msk.f32.vlgmr.msra.gmra.mrb[14].mxu0 %vm64_vm0, %v1551_v60 }
 0x6e4   :  { %v1831_v61 = vpop.f32.mrb[14].mxu0 }
 0x6e5   :  { %1638 = vst.msk [vmem:[#allocation9 + $0x8] sm:$0xff] %vm64_vm0, %v1831_v61  ;;  %v1628_v62 = vpop.f32.mrb[15].mxu0 }
 0x6e6   :  { %1637 = vst.msk [vmem:[#allocation9] sm:$0xff] %vm64_vm0, %v1628_v62 }
 0x6e7   :  { %1980 = shalt.err (!%p1977_p0)
}
 0x6e8   :  { %s1981_s25 = scalar_lea.hbm %s2293_s5, 256 }
 0x6e9   :  { %p1982_p1 = scmp.ne.s32.totalorder %s2293_s5, %s1981_s25  ;;  %p1985_p2 = scmp.lt.u32.totalorder %s1981_s25, %s2293_s5 }
 0x6eb   :  { %p1987_p3 = pnand %p1985_p2, %p1982_p1 }
 0x6ed   :  { %1990 = shalt.err (!%p1987_p3)
}
 0x6ee   :  { %1650 = dma.vmem_to_hbm [thread:$0]  %s1645_s20, 256, %s2293_s5, [#allocation5], %s1999_s30, %s1999_s30, %s2000_s6  }
 0x6ef   :  { %1995 = dma.done.wait [#allocation5], 256  }
 0x6f0   :  { %1996 = vsyncadd [#allocation5], 4294967040 }
 0x6f1   :  { %1654 = vsyncpa [#allocation4], 1 }
 0x6f2   :  { %1655 = vsyncpa [#allocation7], 1 }
 0x6f3   :  { %1656 = vsyncpa [#allocation5], 1 }

</bundles_post_ra>
